<compile_context>
chip_gen: v6e
topology: v6e:2x2x1
jax: 0.10.0
libtpu: 0.0.40
codegen_flags: <defaults>
</compile_context>

<pallas_src>
import jax
import jax.numpy as jnp
from jax.experimental import pallas as pl
from jax.experimental.pallas import tpu as pltpu

# ----------------------------- problem sizes --------------------------------
B = 2                      # batch
T = 16                     # sequence length
D = 32                     # embedding_dim
F = 32                     # n_filters
FILTER_SIZES = (3, 4, 5)   # filter_sizes
KMAX = max(FILTER_SIZES)
NCONV = len(FILTER_SIZES)
F_TOTAL = NCONV * F        # latent size = 96
N_OUT = 2                  # fc output size
BT = B * T

K_RAW = KMAX * D           # 160 (fused contraction depth)
K_PAD = 256                # padded to a lane/MXU-friendly depth
N_PAD = 128                # conv-output / output-slab width padded to one lane span


# ------------------------------- kernel -------------------------------------
def textcnn_kernel(xcat_ref, wconv_ref, bconv_ref, wfc_ref, bfc_ref, out_ref):
    """Whole batch in one grid step.

    xcat_ref : (BT, K_PAD)   bf16  time-shifted + concatenated embeddings (zero padded)
    wconv_ref: (K_PAD, N_PAD) bf16 fused conv weights (zero rows/cols in the padding)
    bconv_ref: (1, N_PAD)    f32   fused conv bias (zero in padded lanes)
    wfc_ref  : (N_PAD, N_PAD) bf16 fc weight placed in columns F_TOTAL..F_TOTAL+1
    bfc_ref  : (1, N_PAD)    f32   fc bias in lanes F_TOTAL..F_TOTAL+1
    out_ref  : (B, N_PAD)    f32   res in lanes 0..F_TOTAL-1, logits in the next two
    """
    # All filter sizes fused into ONE MXU matmul; f32 accumulation.
    c = jnp.dot(xcat_ref[...], wconv_ref[...],
                preferred_element_type=jnp.float32) + bconv_ref[...]
    c = jnp.maximum(c, 0.0)                                       # ReLU

    # In-kernel validity mask (no extra HBM stream): conv position t of filter size
    # fs is valid iff t < T - fs + 1.  ReLU output >= 0, so zeroing the invalid
    # positions cannot change the max (same semantics as relu -> max_pool1d).
    lane = jax.lax.broadcasted_iota(jnp.int32, (T, N_PAD), 1)
    trow = jax.lax.broadcasted_iota(jnp.int32, (T, N_PAD), 0)
    valid_len = jnp.full((T, N_PAD), T, dtype=jnp.int32)
    for i, fs in enumerate(FILTER_SIZES):
        in_group = (lane >= i * F) & (lane < (i + 1) * F)
        valid_len = jnp.where(in_group, T - fs + 1, valid_len)
    mask = trow < valid_len                                       # (T, N_PAD)

    c3 = jnp.where(mask[None, :, :], c.reshape(B, T, N_PAD), 0.0)
    pooled = jnp.max(c3, axis=1)                                  # (B, N_PAD) f32
    # pooled lanes >= F_TOTAL are exactly 0 (zero weights, zero bias, ReLU, mask).

    # Lane-dense output slab: res passes through untouched (f32); logits land in
    # lanes F_TOTAL..F_TOTAL+1 via a matmul against the column-shifted packed fc.
    logits_slab = jnp.dot(pooled.astype(jnp.bfloat16), wfc_ref[...],
                          preferred_element_type=jnp.float32) + bfc_ref[...]
    out_ref[...] = pooled + logits_slab


# --------------------------- one-time parameter packing ----------------------
def pack_params(params):
    """Pack once at init (hoisted out of the forward path)."""
    zeros = jnp.zeros((D, F), jnp.float32)
    rows = []
    for k in range(KMAX):
        blocks = [params["conv_w"][i][k] if k < fs else zeros
                  for i, fs in enumerate(FILTER_SIZES)]
        rows.append(jnp.concatenate(blocks, axis=1))              # (D, F_TOTAL)
    w_conv = jnp.concatenate(rows, axis=0)                        # (K_RAW, F_TOTAL)
    w_conv = jnp.pad(w_conv, ((0, K_PAD - K_RAW), (0, N_PAD - F_TOTAL)))
    b_conv = jnp.concatenate(params["conv_b"], axis=0)
    b_conv = jnp.pad(b_conv, (0, N_PAD - F_TOTAL)).reshape(1, N_PAD)

    # fc weight shifted into columns F_TOTAL..F_TOTAL+1 of a (N_PAD, N_PAD) slab,
    # so res + logits come out of one lane-dense output write.
    w_fc = jnp.zeros((N_PAD, N_PAD), jnp.float32)
    w_fc = w_fc.at[:F_TOTAL, F_TOTAL:F_TOTAL + N_OUT].set(params["w_fc"])
    b_fc = jnp.zeros((1, N_PAD), jnp.float32)
    b_fc = b_fc.at[0, F_TOTAL:F_TOTAL + N_OUT].set(params["b_fc"].reshape(-1))

    return (w_conv.astype(jnp.bfloat16), b_conv,
            w_fc.astype(jnp.bfloat16), b_fc)


# ------------------------------- wrapper -------------------------------------
def _full_spec(a):
    return pl.BlockSpec(a.shape, lambda i, _nd=a.ndim: (0,) * _nd)


@jax.jit
def textcnn_forward(x, packed):
    """x: (B, T, D) f32; packed = pack_params(...). Returns (res, logits)."""
    w_conv, b_conv, w_fc, b_fc = packed

    # Time-shift + lane-concat (layout plumbing) in the wrapper, zero-padded past
    # the end of the sequence and out to the lane-aligned contraction depth.
    shifted = [jnp.pad(x[:, k:, :], ((0, 0), (0, k), (0, 0))) for k in range(KMAX)]
    xcat = jnp.concatenate(shifted, axis=-1).reshape(BT, K_RAW)
    xcat = jnp.pad(xcat, ((0, 0), (0, K_PAD - K_RAW))).astype(jnp.bfloat16)

    out = pl.pallas_call(
        textcnn_kernel,
        out_shape=jax.ShapeDtypeStruct((B, N_PAD), jnp.float32),
        grid_spec=pltpu.PrefetchScalarGridSpec(
            num_scalar_prefetch=0,
            grid=(1,),                                            # whole batch, one step
            in_specs=[_full_spec(xcat), _full_spec(w_conv), _full_spec(b_conv),
                      _full_spec(w_fc), _full_spec(b_fc)],
            out_specs=pl.BlockSpec((B, N_PAD), lambda i: (0, 0)),
        ),
        compiler_params=pltpu.CompilerParams(
            dimension_semantics=("arbitrary",)),
    )(xcat, w_conv, b_conv, w_fc, b_fc)

    # TODO(synk): nn.Dropout is identity here (eval-mode semantics).
    res = out[:, :F_TOTAL]
    logits = out[:, F_TOTAL:F_TOTAL + N_OUT]
    return res, logits


# --------------------------- pure-JAX f32 reference ---------------------------
def ref_forward(x, params):
    pooled = []
    for i, fs in enumerate(FILTER_SIZES):
        w = params["conv_w"][i]                                   # (fs, D, F)
        L = T - fs + 1
        c = sum(x[:, k:k + L, :] @ w[k] for k in range(fs)) + params["conv_b"][i]
        pooled.append(jnp.max(jnp.maximum(c, 0.0), axis=1))       # (B, F)
    res = jnp.concatenate(pooled, axis=1)                         # (B, F_TOTAL)
    logits = res @ params["w_fc"] + params["b_fc"]
    return res, logits


# ---------------------------------- main -------------------------------------
if __name__ == "__main__":
    keys = jax.random.split(jax.random.PRNGKey(0), 2 * NCONV + 3)
    ki = iter(keys)

    x = jax.random.normal(next(ki), (B, T, D), dtype=jnp.float32)

    s = 0.1
    params = {
        # conv_w[i] is tap-major: conv_w[i][k] == (D, F) == torch weight[:, :, k].T
        "conv_w": [s * jax.random.normal(next(ki), (fs, D, F), jnp.float32)
                   for fs in FILTER_SIZES],
        "conv_b": [s * jax.random.normal(next(ki), (F,), jnp.float32)
                   for _ in FILTER_SIZES],
        "w_fc": s * jax.random.normal(next(ki), (F_TOTAL, 2), jnp.float32),
        "b_fc": s * jax.random.normal(next(ki), (1, 2), jnp.float32),
    }

    packed = pack_params(params)              # hoisted: runs once, not per forward
    jax.block_until_ready(packed)

    res, logits = textcnn_forward(x, packed)
    jax.block_until_ready((res, logits))

    res_ref, logits_ref = ref_forward(x, params)
    # bf16 operands (f32 accumulation) -> loosened tolerance vs. the f32 reference.
    assert jnp.allclose(res, res_ref, atol=5e-2, rtol=5e-2), "res mismatch"
    assert jnp.allclose(logits, logits_ref, atol=5e-2, rtol=5e-2), "logits mismatch"

    print("KERNEL_OK")
</pallas_src>

<mosaic_0001>
module attributes {stable_mosaic.version = 11 : i64} {
  func.func @textcnn_kernel(%arg0: i32, %arg1: memref<32x256xbf16, #tpu.memory_space<vmem>>, %arg2: memref<256x128xbf16, #tpu.memory_space<vmem>>, %arg3: memref<1x128xf32, #tpu.memory_space<vmem>>, %arg4: memref<128x128xbf16, #tpu.memory_space<vmem>>, %arg5: memref<1x128xf32, #tpu.memory_space<vmem>>, %arg6: memref<2x128xf32, #tpu.memory_space<vmem>>) attributes {dimension_semantics = [#tpu.dimension_semantics<arbitrary>], iteration_bounds = array<i64: 1>, scalar_prefetch = 0 : i64, scratch_operands = 0 : i64, tpu.core_type = #tpu.core_type<tc>, window_params = [{pipeline_mode = #tpu.pipeline_mode<synchronous>, transform_indices = @transform_0, window_bounds = array<i64: 32, 256>}, {pipeline_mode = #tpu.pipeline_mode<synchronous>, transform_indices = @transform_1, window_bounds = array<i64: 256, 128>}, {pipeline_mode = #tpu.pipeline_mode<synchronous>, transform_indices = @transform_2, window_bounds = array<i64: 1, 128>}, {pipeline_mode = #tpu.pipeline_mode<synchronous>, transform_indices = @transform_3, window_bounds = array<i64: 128, 128>}, {pipeline_mode = #tpu.pipeline_mode<synchronous>, transform_indices = @transform_4, window_bounds = array<i64: 1, 128>}, {pipeline_mode = #tpu.pipeline_mode<synchronous>, transform_indices = @transform_5, window_bounds = array<i64: 2, 128>}]} {
    %c0 = arith.constant 0 : index
    %c0_0 = arith.constant 0 : index
    %0 = vector.load %arg1[%c0, %c0_0] : memref<32x256xbf16, #tpu.memory_space<vmem>>, vector<32x256xbf16>
    %c0_1 = arith.constant 0 : index
    %c0_2 = arith.constant 0 : index
    %1 = vector.load %arg2[%c0_1, %c0_2] : memref<256x128xbf16, #tpu.memory_space<vmem>>, vector<256x128xbf16>
    %cst = arith.constant dense<0.000000e+00> : vector<32x128xf32>
    %2 = tpu.matmul %0, %1, %cst {dimension_numbers = #tpu.dot_dimension_numbers<[1], [0], [0], [1], [0, 0, 1, 1], [], []>} : vector<32x256xbf16>, vector<256x128xbf16>, vector<32x128xf32> -> vector<32x128xf32>
    %c0_3 = arith.constant 0 : index
    %c0_4 = arith.constant 0 : index
    %3 = vector.load %arg3[%c0_3, %c0_4] : memref<1x128xf32, #tpu.memory_space<vmem>>, vector<1x128xf32>
    %4 = vector.broadcast %3 : vector<1x128xf32> to vector<32x128xf32>
    %5 = arith.addf %2, %4 : vector<32x128xf32>
    %cst_5 = arith.constant 0.000000e+00 : f32
    %6 = vector.broadcast %cst_5 : f32 to vector<32x128xf32>
    %7 = arith.maximumf %5, %6 : vector<32x128xf32>
    %8 = tpu.iota {dimensions = array<i32: 1>} : vector<16x128xi32>
    %9 = tpu.iota {dimensions = array<i32: 0>} : vector<16x128xi32>
    %c16_i32 = arith.constant 16 : i32
    %10 = vector.broadcast %c16_i32 : i32 to vector<16x128xi32>
    %c0_i32 = arith.constant 0 : i32
    %11 = vector.broadcast %c0_i32 : i32 to vector<16x128xi32>
    %12 = arith.cmpi sge, %8, %11 : vector<16x128xi32>
    %c32_i32 = arith.constant 32 : i32
    %13 = vector.broadcast %c32_i32 : i32 to vector<16x128xi32>
    %14 = arith.cmpi slt, %8, %13 : vector<16x128xi32>
    %15 = arith.andi %12, %14 : vector<16x128xi1>
    %c14_i32 = arith.constant 14 : i32
    %16 = vector.broadcast %c14_i32 : i32 to vector<16x128xi32>
    %17 = arith.select %15, %16, %10 : vector<16x128xi1>, vector<16x128xi32>
    %c32_i32_6 = arith.constant 32 : i32
    %18 = vector.broadcast %c32_i32_6 : i32 to vector<16x128xi32>
    %19 = arith.cmpi sge, %8, %18 : vector<16x128xi32>
    %c64_i32 = arith.constant 64 : i32
    %20 = vector.broadcast %c64_i32 : i32 to vector<16x128xi32>
    %21 = arith.cmpi slt, %8, %20 : vector<16x128xi32>
    %22 = arith.andi %19, %21 : vector<16x128xi1>
    %c13_i32 = arith.constant 13 : i32
    %23 = vector.broadcast %c13_i32 : i32 to vector<16x128xi32>
    %24 = arith.select %22, %23, %17 : vector<16x128xi1>, vector<16x128xi32>
    %c64_i32_7 = arith.constant 64 : i32
    %25 = vector.broadcast %c64_i32_7 : i32 to vector<16x128xi32>
    %26 = arith.cmpi sge, %8, %25 : vector<16x128xi32>
    %c96_i32 = arith.constant 96 : i32
    %27 = vector.broadcast %c96_i32 : i32 to vector<16x128xi32>
    %28 = arith.cmpi slt, %8, %27 : vector<16x128xi32>
    %29 = arith.andi %26, %28 : vector<16x128xi1>
    %c12_i32 = arith.constant 12 : i32
    %30 = vector.broadcast %c12_i32 : i32 to vector<16x128xi32>
    %31 = arith.select %29, %30, %24 : vector<16x128xi1>, vector<16x128xi32>
    %32 = arith.cmpi slt, %9, %31 : vector<16x128xi32>
    %33 = vector.shape_cast %32 : vector<16x128xi1> to vector<1x16x128xi1>
    %34 = vector.shape_cast %7 : vector<32x128xf32> to vector<2x16x128xf32>
    %cst_8 = arith.constant 0.000000e+00 : f32
    %35 = vector.shape_cast %33 : vector<1x16x128xi1> to vector<1x16x128xi1>
    %36 = vector.broadcast %35 : vector<1x16x128xi1> to vector<2x16x128xi1>
    %37 = vector.broadcast %cst_8 : f32 to vector<2x16x128xf32>
    %38 = arith.select %36, %34, %37 : vector<2x16x128xi1>, vector<2x16x128xf32>
    %cst_9 = arith.constant dense<0xFF800000> : vector<2x128xf32>
    %39 = vector.multi_reduction <maximumf>, %38, %cst_9 [1] : vector<2x16x128xf32> to vector<2x128xf32>
    %40 = arith.truncf %39 : vector<2x128xf32> to vector<2x128xbf16>
    %c0_10 = arith.constant 0 : index
    %c0_11 = arith.constant 0 : index
    %41 = vector.load %arg4[%c0_10, %c0_11] : memref<128x128xbf16, #tpu.memory_space<vmem>>, vector<128x128xbf16>
    %cst_12 = arith.constant dense<0.000000e+00> : vector<2x128xf32>
    %42 = tpu.matmul %40, %41, %cst_12 {dimension_numbers = #tpu.dot_dimension_numbers<[1], [0], [0], [1], [0, 0, 1, 1], [], []>} : vector<2x128xbf16>, vector<128x128xbf16>, vector<2x128xf32> -> vector<2x128xf32>
    %c0_13 = arith.constant 0 : index
    %c0_14 = arith.constant 0 : index
    %43 = vector.load %arg5[%c0_13, %c0_14] : memref<1x128xf32, #tpu.memory_space<vmem>>, vector<1x128xf32>
    %44 = vector.broadcast %43 : vector<1x128xf32> to vector<2x128xf32>
    %45 = arith.addf %42, %44 : vector<2x128xf32>
    %46 = arith.addf %39, %45 : vector<2x128xf32>
    %c0_15 = arith.constant 0 : index
    %c0_16 = arith.constant 0 : index
    %47 = vector.load %arg6[%c0_15, %c0_16] : memref<2x128xf32, #tpu.memory_space<vmem>>, vector<2x128xf32>
    tpu.vector_store %arg6[%c0_15, %c0_16], %46 {strides = array<i32>} : memref<2x128xf32, #tpu.memory_space<vmem>>, vector<2x128xf32>,
    return
  }
  func.func @transform_0(%arg0: i32) -> (i32, i32) {
    %c0_i32 = arith.constant 0 : i32
    %c0_i32_0 = arith.constant 0 : i32
    %c0_i32_1 = arith.constant 0 : i32
    return %c0_i32, %c0_i32_0 : i32, i32
  }
  func.func @transform_1(%arg0: i32) -> (i32, i32) {
    %c0_i32 = arith.constant 0 : i32
    %c0_i32_0 = arith.constant 0 : i32
    %c0_i32_1 = arith.constant 0 : i32
    return %c0_i32, %c0_i32_0 : i32, i32
  }
  func.func @transform_2(%arg0: i32) -> (i32, i32) {
    %c0_i32 = arith.constant 0 : i32
    %c0_i32_0 = arith.constant 0 : i32
    %c0_i32_1 = arith.constant 0 : i32
    return %c0_i32, %c0_i32_0 : i32, i32
  }
  func.func @transform_3(%arg0: i32) -> (i32, i32) {
    %c0_i32 = arith.constant 0 : i32
    %c0_i32_0 = arith.constant 0 : i32
    %c0_i32_1 = arith.constant 0 : i32
    return %c0_i32, %c0_i32_0 : i32, i32
  }
  func.func @transform_4(%arg0: i32) -> (i32, i32) {
    %c0_i32 = arith.constant 0 : i32
    %c0_i32_0 = arith.constant 0 : i32
    %c0_i32_1 = arith.constant 0 : i32
    return %c0_i32, %c0_i32_0 : i32, i32
  }
  func.func @transform_5(%arg0: i32) -> (i32, i32) {
    %c0_i32 = arith.constant 0 : i32
    %c0_i32_0 = arith.constant 0 : i32
    %c0_i32_1 = arith.constant 0 : i32
    return %c0_i32, %c0_i32_0 : i32, i32
  }
}

</mosaic_0001>

<bundles_post_ra>
// kernel: textcnn_forward.1
= control target key start
LH: loop header
LB: loop body
LE: loop exit
PB: predicated region body
PF: predicated region fallthrough
CT: control target
= control target key end

     0   :  { %v531_v20 = vmov 0.0   ;;  %vm532_vm0 = vmmov 0   ;;  %v233_v29 = vlaneseq  ;;  %v533_v32 = vmov 16   ;;  %s663_s1 = inlined_call_operand.vmem [shape: bf16[256,128], index: 1, kind: input, shape index: {}]   ;;  %s664_s0 = inlined_call_operand.vmem [shape: bf16[32,256], index: 0, kind: input, shape index: {}]   ;;  %s665_s3 = inlined_call_operand.vmem [shape: bf16[128,128], index: 3, kind: input, shape index: {}]   ;;  %s666_s2 = inlined_call_operand.vmem [shape: f32[1,128], index: 2, kind: input, shape index: {}]   ;;  %s667_s4 = inlined_call_operand.vmem [shape: f32[1,128], index: 4, kind: input, shape index: {}]   ;;  %s668_s5 = inlined_call_operand.vmem [shape: f32[2,128], index: 5, kind: output, shape index: {}]  }
   0x1   :  { %v501_v0 = vld [vmem:[%s663_s1 + $0x78] sm:$0xff]   ;;  %v503_v2 = vld [vmem:[%s663_s1 + $0x70] sm:$0xff]   ;;  %v505_v4 = vld [vmem:[%s663_s1 + $0x68] sm:$0xff]   ;;  %478 = vmatprep.subr.bf16.mxu1 %v531_v20  ;;  %494 = vmatprep.mubr.msk.bf16.mxu1 %vm532_vm0, %v531_v20  ;;  %vm303_vm10 = vcmask 1041409  }
   0x2   :  { %v502_v1 = vld [vmem:[%s663_s1 + $0x38] sm:$0xff]   ;;  %441 = vmatprep.subr.bf16.mxu0 %v501_v0  ;;  %v504_v3 = vld [vmem:[%s663_s1 + $0x30] sm:$0xff]   ;;  %v506_v5 = vld [vmem:[%s663_s1 + $0x28] sm:$0xff]   ;;  %v234_v30 = vand.u32 127, %v233_v29  ;;  %v236_v37 = vshrl.u32 %v233_v29, 7 }
   0x3   :  { %442 = vmatpush3.bf16.msra.mxu0 %v502_v1  ;;  %v507_v6 = vld [vmem:[%s663_s1 + $0x60] sm:$0xff]   ;;  %v509_v8 = vld [vmem:[%s663_s1 + $0x58] sm:$0xff]   ;;  %v511_v10 = vld [vmem:[%s663_s1 + $0x50] sm:$0xff]  }
   0x4   :  { %443 = vmatprep.subr.bf16.mxu0 %v503_v2  ;;  %v508_v7 = vld [vmem:[%s663_s1 + $0x20] sm:$0xff]   ;;  %v510_v9 = vld [vmem:[%s663_s1 + $0x18] sm:$0xff]   ;;  %v512_v12 = vld [vmem:[%s663_s1 + $0x10] sm:$0xff]   ;;  %vm239_vm1 = vcmp.lt.s32.totalorder %v234_v30, 32  ;;  %vm242_vm2 = vcmp.ge.s32.totalorder %v234_v30, 32  ;;  %vm243_vm3 = vcmp.lt.s32.totalorder %v234_v30, 64 }
   0x5   :  { %v519_v11 = vld [vmem:[%s664_s0 + $0x4] ss:$8 sps:$4 sm:$0xff]   ;;  %v517_v17 = vld [vmem:[%s664_s0] ss:$8 sps:$4 sm:$0xff]   ;;  %v520_v18 = vld [vmem:[%s664_s0 + $0x14] ss:$8 sps:$4 sm:$0xff]  }
   0x6   :  { %212 = vmatprep.mubr.bf16.mxu0 %v519_v11  ;;  %v513_v13 = vld [vmem:[%s663_s1 + $0x48] sm:$0xff]   ;;  %v515_v15 = vld [vmem:[%s663_s1 + $0x40] sm:$0xff]   ;;  %v522_v19 = vld [vmem:[%s664_s0 + $0x10] ss:$8 sps:$4 sm:$0xff]   ;;  %v241_v33 = vsel %vm239_vm1, 14, %v533_v32  ;;  %vm246_vm5 = vcmp.ge.s32.totalorder %v234_v30, 64 }
   0x7   :  { %444 = vmatpush3.bf16.msra.mxu0 %v504_v3  ;;  %v514_v14 = vld [vmem:[%s663_s1 + $0x8] sm:$0xff]   ;;  %v516_v16 = vld [vmem:[%s663_s1] sm:$0xff]   ;;  %v523_v21 = vld [vmem:[%s665_s3 + $0x38] sm:$0xff]   ;;  %vm247_vm6 = vcmp.lt.s32.totalorder %v234_v30, 96  ;;  %v237_v42 = vadd.s32 8, %v236_v37 }
   0x8   :  { %445 = vmatprep.subr.bf16.mxu0 %v505_v4  ;;  %479 = vmatpush3.bf16.msra.mxu1 %v523_v21  ;;  %v524_v22 = vld [vmem:[%s665_s3 + $0x30] sm:$0xff]   ;;  %v525_v23 = vld [vmem:[%s665_s3 + $0x28] sm:$0xff]   ;;  %v526_v24 = vld [vmem:[%s665_s3 + $0x20] sm:$0xff]  }
   0x9   :  { %480 = vmatprep.subr.bf16.mxu1 %v531_v20  ;;  %v527_v25 = vld [vmem:[%s665_s3 + $0x18] sm:$0xff]   ;;  %v528_v26 = vld [vmem:[%s665_s3 + $0x10] sm:$0xff]   ;;  %v529_v27 = vld [vmem:[%s665_s3 + $0x8] sm:$0xff]  }
   0xa   :  { %v530_v28 = vld [vmem:[%s665_s3] sm:$0xff]   ;;  %vm244_vm4 = vmand %vm242_vm2, %vm243_vm3 }
   0xb   :  { %446 = vmatpush3.bf16.msra.mxu0 %v506_v5  ;;  %v411_v34 = vld [vmem:[%s666_s2] ss:$0 sm:$0xff]  ;;  %v245_v38 = vsel %vm244_vm4, 13, %v241_v33  ;;  %vm248_vm7 = vmand %vm246_vm5, %vm247_vm6 }
   0xc   :  { %447 = vmatprep.subr.bf16.mxu0 %v507_v6  ;;  %481 = vmatpush3.bf16.msra.mxu1 %v524_v22  ;;  %v249_v43 = vsel %vm248_vm7, 12, %v245_v38 }
   0xd   :  { %482 = vmatprep.subr.bf16.mxu1 %v531_v20  ;;  %vm250_vm8 = vcmp.lt.s32.totalorder %v236_v37, %v249_v43  ;;  %vm251_vm9 = vcmp.lt.s32.totalorder %v237_v42, %v249_v43 }
   0xf   :  { %448 = vmatpush3.bf16.msra.mxu0 %v508_v7 }
  0x10   :  { %449 = vmatprep.subr.bf16.mxu0 %v509_v8  ;;  %483 = vmatpush3.bf16.msra.mxu1 %v525_v23 }
  0x11   :  { %484 = vmatprep.subr.bf16.mxu1 %v531_v20 }
  0x13   :  { %450 = vmatpush3.bf16.msra.mxu0 %v510_v9 }
  0x14   :  { %451 = vmatprep.subr.bf16.mxu0 %v511_v10  ;;  %485 = vmatpush3.bf16.msra.mxu1 %v526_v24 }
  0x15   :  { %486 = vmatprep.subr.bf16.mxu1 %v531_v20 }
  0x17   :  { %452 = vmatpush3.bf16.msra.mxu0 %v512_v12 }
  0x18   :  { %453 = vmatprep.subr.bf16.mxu0 %v513_v13  ;;  %487 = vmatpush3.bf16.msra.mxu1 %v527_v25 }
  0x19   :  { %488 = vmatprep.subr.bf16.mxu1 %v531_v20 }
  0x1b   :  { %454 = vmatpush3.bf16.msra.mxu0 %v514_v14 }
  0x1c   :  { %455 = vmatprep.subr.bf16.mxu0 %v515_v15  ;;  %489 = vmatpush3.bf16.msra.mxu1 %v528_v26 }
  0x1d   :  { %490 = vmatprep.subr.bf16.mxu1 %v531_v20 }
  0x1f   :  { %456 = vmatpush3.bf16.msra.mxu0 %v516_v16 }
  0x20   :  { %491 = vmatpush3.bf16.msra.mxu1 %v529_v27 }
  0x21   :  { %492 = vmatprep.subr.bf16.mxu1 %v531_v20 }
  0x22   :  { %213 = vmatmul.mubr.bf16.vlgmr.msra.gmra.mxu0 %v517_v17 }
  0x23   :  { %220 = vmatprep.mubr.bf16.mxu0 %v520_v18  ;;  %v432_v18 = vld [vmem:[%s667_s4] ss:$0 sm:$0xff] }
  0x24   :  { %493 = vmatpush3.bf16.msra.mxu1 %v530_v28 }
  0x2a   :  { %221 = vmatmul.mubr.bf16.gmra.mxu0 %v522_v19 }
  0xe2   :  { %v457_v31 = vpop.f32.mrf.mxu0 }
  0xe4   :  { %v458_v35 = vpop.f32.mrf.mxu0 }
  0xe5   :  { %v459_v36 = vadd.f32 %v458_v35, %v457_v31 }
  0xe6   :  { %v460_v39 = vpop.f32.mrf.mxu0 }
  0xe7   :  { %v215_v40 = vadd.f32 %v459_v36, %v411_v34 }
  0xe8   :  { %v461_v41 = vpop.f32.mrf.mxu0 }
  0xe9   :  { %v462_v44 = vadd.f32 %v461_v41, %v460_v39  ;;  %v229_v46 = vmax.f32 %v215_v40, 0.0 }
  0xea   :  { %v463_v45 = vpop.f32.mrf.mxu0 }
  0xeb   :  { %v218_v47 = vadd.f32 %v462_v44, %v411_v34  ;;  %v256_v52 = vsel %vm250_vm8, %v229_v46, 0.0 }
  0xec   :  { %v464_v48 = vpop.f32.mrf.mxu0 }
  0xed   :  { %v230_v49 = vmax.f32 %v218_v47, 0.0  ;;  %v465_v50 = vadd.f32 %v464_v48, %v463_v45 }
  0xee   :  { %v466_v51 = vpop.f32.mrf.mxu0 }
  0xef   :  { %v257_v53 = vsel %vm251_vm9, %v230_v49, 0.0  ;;  %v223_v54 = vadd.f32 %v465_v50, %v411_v34 }
  0xf0   :  { %v260_v55 = vmax.f32 %v256_v52, %v257_v53  ;;  %v467_v56 = vpop.f32.mrf.mxu0 }
  0xf1   :  { %v468_v57 = vadd.f32 %v467_v56, %v466_v51  ;;  %v231_v59 = vmax.f32 %v223_v54, 0.0 }
  0xf2   :  { %v261_v58 = vrot.slane %v260_v55, 4 }
  0xf3   :  { %v226_v60 = vadd.f32 %v468_v57, %v411_v34  ;;  %v258_v0 = vsel %vm250_vm8, %v231_v59, 0.0 }
  0xf4   :  { %v262_v61 = vmax.f32 %v260_v55, %v261_v58 }
  0xf5   :  { %v232_v62 = vmax.f32 %v226_v60, 0.0 }
  0xf6   :  { %v263_v63 = vrot.slane %v262_v61, 2 }
  0xf7   :  { %v259_v1 = vsel %vm251_vm9, %v232_v62, 0.0 }
  0xf8   :  { %v264_v2 = vmax.f32 %v262_v61, %v263_v63  ;;  %v267_v3 = vmax.f32 %v258_v0, %v259_v1 }
  0xfa   :  { %v268_v4 = vrot.slane %v267_v3, 4  ;;  %v265_v5 = vrot.slane %v264_v2, 1 }
  0xfc   :  { %v269_v6 = vmax.f32 %v267_v3, %v268_v4  ;;  %v266_v9 = vmax.f32 %v264_v2, %v265_v5 }
  0xfe   :  { %v270_v7 = vrot.slane %v269_v6, 2  ;;  %v274_v12 = vpack.c.bf16 %v266_v9, %v266_v9 }
 0x100   :  { %v271_v8 = vmax.f32 %v269_v6, %v270_v7  ;;  %v301_v14 = vunpack.c.l.b16 %v274_v12 }
 0x102   :  { %v272_v10 = vrot.slane %v271_v8, 1 }
 0x104   :  { %v273_v11 = vmax.f32 %v271_v8, %v272_v10 }
 0x106   :  { %v275_v13 = vpack.c.bf16 %v273_v11, %v273_v11 }
 0x108   :  { %v302_v15 = vunpack.c.l.b16 %v275_v13 }
 0x10a   :  { %v304_v16 = vsel %vm303_vm10, %v302_v15, %v301_v14 }
 0x10b   :  { %v305_v17 = vpack.c.b16 %v304_v16, %v304_v16 }
 0x10d   :  { %495 = vmatmul.mubr.bf16.vlgmr.msra.gmra.mxu1 %v305_v17 }
 0x1cd   :  { %v389_v19 = vpop.f32.mrf.mxu1 }
 0x1ce   :  { %v390_v20 = vadd.f32 %v432_v18, %v389_v19 }
 0x1cf   :  { %v496_v21 = vpop.f32.mrf.mxu1 }
 0x1d0   :  { %v396_v22 = vrot.slane %v390_v20, 1  ;;  %v399_v26 = vadd.f32 %v390_v20, %v266_v9 }
 0x1d1   :  { %v392_v23 = vpop.f32.mrf.mxu1 }
 0x1d2   :  { %v400_v24 = vadd.f32 %v396_v22, %v273_v11 }
 0x1d3   :  { %v497_v25 = vpop.f32.mrf.mxu1 }
 0x1d4   :  { %v403_v27 = vrot.slane %v400_v24, 7 }
 0x1d6   :  { %v404_v28 = vsel %vm303_vm10, %v403_v27, %v399_v26 }
 0x1d7   :  { %406 = vst [vmem:[%s668_s5] sm:$0x3] %v404_v28 }

</bundles_post_ra>
